<compile_context>
chip_gen: v7x
topology: tpu7x:2x2x1
jax: 0.10.0
libtpu: 0.0.40
codegen_flags: <defaults>
</compile_context>

<pallas_src>
import jax
import jax.numpy as jnp
import numpy as np
from jax.experimental import pallas as pl
from jax.experimental.pallas import tpu as pltpu


def _make_cbam_kernel(Bt, C, H, W, HW, K):
    pad = (K - 1) // 2
    KK = K * K
    nw = 2 * KK  # number of spatial-conv weights (2 in-channels, KxK)

    def kernel(x_ref, w1t_ref, b1_ref, w2t_ref, b2_ref, cp_ref, o_ref):
        f32 = jnp.float32

        w1t = w1t_ref[...]                                # (Cr, C)
        b1 = b1_ref[...]                                  # (Cr, 1)
        w2t = w2t_ref[...]                                # (C, Cr)
        b2 = b2_ref[...]                                  # (C, 1)

        # Conv weights / bias (BN folded) from SMEM — hoisted scalar reads.
        wvals = [cp_ref[i] for i in range(nw)]
        cbias = cp_ref[nw]

        # ---- hoisted column indices & validity masks (shared by all taps) ----
        col = jax.lax.broadcasted_iota(jnp.int32, (1, HW), 1)
        wmod = col % W
        masks = {}
        for ky in range(K):
            dy = ky - pad
            src = col + dy * W
            row_ok = (src >= 0) & (src < HW)
            for kx in range(K):
                dx = kx - pad
                if dy == 0 and dx == 0:
                    continue
                col_ok = (wmod + dx >= 0) & (wmod + dx < W)
                masks[(ky, kx)] = row_ok & col_ok

        # Row selector for the stacked (2*Bt, HW) spatial-pool array:
        # rows [0, Bt) are channel-max (conv in-ch 0), rows [Bt, 2Bt) are mean (in-ch 1).
        row = jax.lax.broadcasted_iota(jnp.int32, (2 * Bt, 1), 0)
        is_max_row = row < Bt

        inv_hw = f32(1.0 / HW)
        inv_c = f32(1.0 / C)

        # ---------------- Channel gate ----------------
        # Tiny pooled columns per image, then ONE batched MLP over all 2*Bt columns.
        cols = []
        for b in range(Bt):
            xb = x_ref[b].astype(f32)                                 # (C, HW)
            cols.append(jnp.sum(xb, axis=1, keepdims=True) * inv_hw)  # avg column
        for b in range(Bt):
            xb = x_ref[b].astype(f32)
            cols.append(jnp.max(xb, axis=1, keepdims=True))           # max column
        pooled = jnp.concatenate(cols, axis=1)                        # (C, 2*Bt)

        h = jnp.dot(w1t, pooled, preferred_element_type=f32) + b1
        h = jnp.maximum(h, 0.0)                                       # (Cr, 2*Bt)
        out2 = jnp.dot(w2t, h, preferred_element_type=f32) + b2       # (C, 2*Bt)
        att = jax.nn.sigmoid(out2[:, :Bt] + out2[:, Bt:])             # (C, Bt)

        # Channel scaling + spatial pooling (full (C,HW)-wide work per image).
        xcg_list, cmax_list, cmean_list = [], [], []
        for b in range(Bt):
            xb = x_ref[b].astype(f32)                                 # (C, HW)
            xcg = xb * att[:, b:b + 1]                                # (C, HW)
            xcg_list.append(xcg)
            cmax_list.append(jnp.max(xcg, axis=0, keepdims=True))     # (1, HW)
            cmean_list.append(jnp.sum(xcg, axis=0, keepdims=True) * inv_c)

        # ---------------- Spatial (attention) gate ----------------
        # Batch-packed: one roll / mask / mul per tap for ALL Bt images & both pools.
        stacked = jnp.concatenate(cmax_list + cmean_list, axis=0)     # (2*Bt, HW)

        partials = []
        for ky in range(K):
            dy = ky - pad
            for kx in range(K):
                dx = kx - pad
                s = dy * W + dx                                       # flattened shift
                wcol = jnp.where(is_max_row,
                                 wvals[ky * K + kx],
                                 wvals[KK + ky * K + kx])             # (2*Bt, 1)
                a = stacked
                if not (dy == 0 and dx == 0):
                    if s != 0:
                        # a_new[p] = a[p + s]  (jnp.roll semantics, shift = -s)
                        a = pltpu.roll(a, (-s) % HW, 1)
                    a = jnp.where(masks[(ky, kx)], a, 0.0)
                partials.append(a * wcol)

        # Tree-sum the partial accumulators (exposes VALU ILP).
        while len(partials) > 1:
            nxt = []
            for i in range(0, len(partials) - 1, 2):
                nxt.append(partials[i] + partials[i + 1])
            if len(partials) % 2:
                nxt.append(partials[-1])
            partials = nxt
        acc = partials[0]                                             # (2*Bt, HW)

        conv = acc[:Bt] + acc[Bt:] + cbias                            # (Bt, HW)
        sgate = jax.nn.sigmoid(conv)                                  # one EUP pass

        for b in range(Bt):
            o_ref[b] = (xcg_list[b] * sgate[b:b + 1, :]).astype(o_ref.dtype)

    return kernel


def cbam_forward(x, params, kernel_size=3):
    """x: (B, C, H, W) NCHW (any float dtype; compute is f32 inside the kernel)."""
    B, C, H, W = x.shape
    HW = H * W
    K = kernel_size
    Cr = params["w1"].shape[1]
    itemsize = jnp.dtype(x.dtype).itemsize

    # ---- parameter glue (plain JAX) ----
    w1t = params["w1"].T.astype(jnp.float32)                          # (Cr, C)
    b1c = params["b1"].reshape(Cr, 1).astype(jnp.float32)
    w2t = params["w2"].T.astype(jnp.float32)                          # (C, Cr)
    b2c = params["b2"].reshape(C, 1).astype(jnp.float32)
    # fold eval-mode BatchNorm2d(1) into the spatial conv
    s = params["bn_gamma"] / jnp.sqrt(params["bn_var"] + 1e-5)
    cw = (params["conv_w"] * s).reshape(-1)                           # (2*K*K,)
    cb = (params["conv_b"] - params["bn_mean"]) * s + params["bn_beta"]
    convp = jnp.concatenate([cw, cb]).astype(jnp.float32)             # (2*K*K+1,)
    nparams = 2 * K * K + 1

    # Full-HW blocks (no host pad / slice): block dims equal to full array dims
    # are exempt from the (8,128) divisibility rule.
    xf = x.reshape(B, C, HW)

    # ---- batch-tile sizing (HBM-bound kernel: biggest block that fits VMEM) ----
    try:
        vmem_cap = int(pltpu.get_tpu_info().vmem_capacity_bytes)
    except Exception:  # pragma: no cover - conservative fallback
        vmem_cap = 64 * 1024 * 1024
    # ~6-8 MiB blocks on 128 MiB-VMEM chips (v5e/v6e), ~3 MiB on v7x (64 MiB).
    target_block = max(1 << 20, min(8 << 20, vmem_cap // 20))
    per_batch_f32 = C * HW * 4                       # dominant f32 working set / image
    max_bt = max(1, target_block // per_batch_f32)
    max_bt = min(max_bt, 64)                         # bound static unroll / concat fan-in
    if B >= 2:
        max_bt = min(max_bt, B // 2)                 # keep >=2 grid steps (v7x dual TC)
    max_bt = max(1, min(max_bt, B))

    best_div = max(d for d in range(1, max_bt + 1) if B % d == 0)
    if 2 * best_div >= max_bt:
        Bt, Bpad = best_div, B                       # exact tiling, no padding
    else:
        # Awkward B (e.g. large prime): pad the batch rather than collapsing Bt.
        Bt = max_bt
        Bpad = ((B + Bt - 1) // Bt) * Bt
        xf = jnp.pad(xf, ((0, Bpad - B), (0, 0), (0, 0)))

    vmem_limit = max(32 << 20, min(64 << 20, (vmem_cap * 3) // 4))

    kernel = _make_cbam_kernel(Bt, C, H, W, HW, K)

    param_bytes = (2 * C * Cr + Cr + C + nparams) * 4
    cost = pl.CostEstimate(
        flops=int(Bpad * (HW * (8 * C + 4 * K * K) + 8 * C * Cr)),
        transcendentals=int(Bpad * (C + HW)),
        bytes_accessed=int(2 * Bpad * C * HW * itemsize + param_bytes),
    )

    out = pl.pallas_call(
        kernel,
        out_shape=jax.ShapeDtypeStruct((Bpad, C, HW), x.dtype),
        grid=(Bpad // Bt,),
        in_specs=[
            pl.BlockSpec((Bt, C, HW), lambda b: (b, 0, 0)),
            pl.BlockSpec((Cr, C), lambda b: (0, 0)),
            pl.BlockSpec((Cr, 1), lambda b: (0, 0)),
            pl.BlockSpec((C, Cr), lambda b: (0, 0)),
            pl.BlockSpec((C, 1), lambda b: (0, 0)),
            pl.BlockSpec((nparams,), lambda b: (0,),
                         memory_space=pltpu.MemorySpace.SMEM),
        ],
        out_specs=pl.BlockSpec((Bt, C, HW), lambda b: (b, 0, 0)),
        compiler_params=pltpu.CompilerParams(
            dimension_semantics=("parallel",),
            vmem_limit_bytes=vmem_limit),
        cost_estimate=cost,
    )(xf, w1t, b1c, w2t, b2c, convp)

    if Bpad != B:
        out = out[:B]
    return out.reshape(B, C, H, W)


def cbam_reference(x, params):
    """Plain-JAX reference (mirrors the PyTorch forward, eval-mode BN)."""
    B, C, H, W = x.shape
    avg = x.mean(axis=(2, 3))
    mx = x.max(axis=(2, 3))

    def mlp(v):
        h = jnp.maximum(v @ params["w1"] + params["b1"], 0.0)
        return h @ params["w2"] + params["b2"]

    att = jax.nn.sigmoid(mlp(avg) + mlp(mx))
    xcg = x * att[:, :, None, None]

    cmax = jnp.max(xcg, axis=1, keepdims=True)
    cmean = jnp.mean(xcg, axis=1, keepdims=True)
    comp = jnp.concatenate([cmax, cmean], axis=1)          # (B, 2, H, W)
    s = params["bn_gamma"] / jnp.sqrt(params["bn_var"] + 1e-5)
    cw = params["conv_w"] * s
    cb = (params["conv_b"] - params["bn_mean"]) * s + params["bn_beta"]
    conv = jax.lax.conv_general_dilated(
        comp, cw, (1, 1), ((1, 1), (1, 1)),
        dimension_numbers=("NCHW", "OIHW", "NCHW")) + cb.reshape(1, 1, 1, 1)
    return xcg * jax.nn.sigmoid(conv)


def make_params(gate_channels=32, reduction_ratio=16, kernel_size=3):
    C = gate_channels
    Cr = C // reduction_ratio
    K = kernel_size
    key = jax.random.PRNGKey(0)
    k = jax.random.split(key, 6)
    return {
        # ChannelGate shared MLP: Linear(C, C/r) -> ReLU -> Linear(C/r, C)
        "w1": 0.1 * jax.random.normal(k[0], (C, Cr), jnp.float32),
        "b1": 0.05 * jax.random.normal(k[1], (Cr,), jnp.float32),
        "w2": 0.1 * jax.random.normal(k[2], (Cr, C), jnp.float32),
        "b2": 0.05 * jax.random.normal(k[3], (C,), jnp.float32),
        # AttentionGate: Conv2d(2, 1, k=3, pad=1) + BatchNorm2d(1) (eval mode)
        "conv_w": 0.1 * jax.random.normal(k[4], (1, 2, K, K), jnp.float32),
        "conv_b": jnp.zeros((1,), jnp.float32),
        "bn_gamma": jnp.ones((1,), jnp.float32),
        "bn_beta": jnp.zeros((1,), jnp.float32),
        "bn_mean": jnp.zeros((1,), jnp.float32),
        "bn_var": jnp.ones((1,), jnp.float32),
    }


if __name__ == "__main__":
    B, C, H, W = 2, 32, 16, 16            # gate_channels=32, reduction_ratio=16
    params = make_params(gate_channels=C, reduction_ratio=16, kernel_size=3)
    x = jax.random.normal(jax.random.PRNGKey(0), (B, C, H, W), jnp.float32)

    y = cbam_forward(x, params, kernel_size=3)
    y = jax.block_until_ready(y)

    y_ref = cbam_reference(x, params)
    np.testing.assert_allclose(np.asarray(y), np.asarray(y_ref),
                               rtol=1e-4, atol=1e-4)
    print("KERNEL_OK")
</pallas_src>

<mosaic_0001>
module attributes {stable_mosaic.version = 11 : i64} {
  func.func @kernel(%arg0: i32, %arg1: memref<1x32x256xf32, #tpu.memory_space<vmem>>, %arg2: memref<2x32xf32, #tpu.memory_space<vmem>>, %arg3: memref<2x1xf32, #tpu.memory_space<vmem>>, %arg4: memref<32x2xf32, #tpu.memory_space<vmem>>, %arg5: memref<32x1xf32, #tpu.memory_space<vmem>>, %arg6: memref<19xf32, #tpu.memory_space<smem>>, %arg7: memref<1x32x256xf32, #tpu.memory_space<vmem>>) attributes {dimension_semantics = [#tpu.dimension_semantics<parallel>], iteration_bounds = array<i64: 2>, scalar_prefetch = 0 : i64, scratch_operands = 0 : i64, tpu.core_type = #tpu.core_type<tc>, window_params = [{transform_indices = @transform_0, window_bounds = array<i64: 1, 32, 256>}, {pipeline_mode = #tpu.pipeline_mode<synchronous>, transform_indices = @transform_1, window_bounds = array<i64: 2, 32>}, {pipeline_mode = #tpu.pipeline_mode<synchronous>, transform_indices = @transform_2, window_bounds = array<i64: 2, 1>}, {pipeline_mode = #tpu.pipeline_mode<synchronous>, transform_indices = @transform_3, window_bounds = array<i64: 32, 2>}, {pipeline_mode = #tpu.pipeline_mode<synchronous>, transform_indices = @transform_4, window_bounds = array<i64: 32, 1>}, {transform_indices = @transform_5, window_bounds = array<i64: 19>}, {transform_indices = @transform_6, window_bounds = array<i64: 1, 32, 256>}]} {
    %c0 = arith.constant 0 : index
    %c0_0 = arith.constant 0 : index
    %0 = vector.load %arg2[%c0, %c0_0] : memref<2x32xf32, #tpu.memory_space<vmem>>, vector<2x32xf32>
    %c0_1 = arith.constant 0 : index
    %c0_2 = arith.constant 0 : index
    %1 = vector.load %arg3[%c0_1, %c0_2] : memref<2x1xf32, #tpu.memory_space<vmem>>, vector<2x1xf32>
    %c0_3 = arith.constant 0 : index
    %c0_4 = arith.constant 0 : index
    %2 = vector.load %arg4[%c0_3, %c0_4] : memref<32x2xf32, #tpu.memory_space<vmem>>, vector<32x2xf32>
    %c0_5 = arith.constant 0 : index
    %c0_6 = arith.constant 0 : index
    %3 = vector.load %arg5[%c0_5, %c0_6] : memref<32x1xf32, #tpu.memory_space<vmem>>, vector<32x1xf32>
    %c0_7 = arith.constant 0 : index
    %4 = memref.load %arg6[%c0_7] : memref<19xf32, #tpu.memory_space<smem>>
    %c1 = arith.constant 1 : index
    %5 = memref.load %arg6[%c1] : memref<19xf32, #tpu.memory_space<smem>>
    %c2 = arith.constant 2 : index
    %6 = memref.load %arg6[%c2] : memref<19xf32, #tpu.memory_space<smem>>
    %c3 = arith.constant 3 : index
    %7 = memref.load %arg6[%c3] : memref<19xf32, #tpu.memory_space<smem>>
    %c4 = arith.constant 4 : index
    %8 = memref.load %arg6[%c4] : memref<19xf32, #tpu.memory_space<smem>>
    %c5 = arith.constant 5 : index
    %9 = memref.load %arg6[%c5] : memref<19xf32, #tpu.memory_space<smem>>
    %c6 = arith.constant 6 : index
    %10 = memref.load %arg6[%c6] : memref<19xf32, #tpu.memory_space<smem>>
    %c7 = arith.constant 7 : index
    %11 = memref.load %arg6[%c7] : memref<19xf32, #tpu.memory_space<smem>>
    %c8 = arith.constant 8 : index
    %12 = memref.load %arg6[%c8] : memref<19xf32, #tpu.memory_space<smem>>
    %c9 = arith.constant 9 : index
    %13 = memref.load %arg6[%c9] : memref<19xf32, #tpu.memory_space<smem>>
    %c10 = arith.constant 10 : index
    %14 = memref.load %arg6[%c10] : memref<19xf32, #tpu.memory_space<smem>>
    %c11 = arith.constant 11 : index
    %15 = memref.load %arg6[%c11] : memref<19xf32, #tpu.memory_space<smem>>
    %c12 = arith.constant 12 : index
    %16 = memref.load %arg6[%c12] : memref<19xf32, #tpu.memory_space<smem>>
    %c13 = arith.constant 13 : index
    %17 = memref.load %arg6[%c13] : memref<19xf32, #tpu.memory_space<smem>>
    %c14 = arith.constant 14 : index
    %18 = memref.load %arg6[%c14] : memref<19xf32, #tpu.memory_space<smem>>
    %c15 = arith.constant 15 : index
    %19 = memref.load %arg6[%c15] : memref<19xf32, #tpu.memory_space<smem>>
    %c16 = arith.constant 16 : index
    %20 = memref.load %arg6[%c16] : memref<19xf32, #tpu.memory_space<smem>>
    %c17 = arith.constant 17 : index
    %21 = memref.load %arg6[%c17] : memref<19xf32, #tpu.memory_space<smem>>
    %c18 = arith.constant 18 : index
    %22 = memref.load %arg6[%c18] : memref<19xf32, #tpu.memory_space<smem>>
    %23 = tpu.iota {dimensions = array<i32: 1>} : vector<1x256xi32>
    %c16_i32 = arith.constant 16 : i32
    %c0_i32 = arith.constant 0 : i32
    %24 = arith.cmpi eq, %c16_i32, %c0_i32 : i32
    %c1_i32 = arith.constant 1 : i32
    %25 = arith.select %24, %c1_i32, %c16_i32 : i32
    %26 = vector.broadcast %25 : i32 to vector<1x256xi32>
    %27 = arith.remsi %23, %26 : vector<1x256xi32>
    %c0_i32_8 = arith.constant 0 : i32
    %28 = vector.broadcast %c0_i32_8 : i32 to vector<1x256xi32>
    %29 = arith.cmpi ne, %27, %28 : vector<1x256xi32>
    %c0_i32_9 = arith.constant 0 : i32
    %30 = vector.broadcast %c0_i32_9 : i32 to vector<1x256xi32>
    %31 = arith.cmpi slt, %27, %30 : vector<1x256xi32>
    %c0_i32_10 = arith.constant 0 : i32
    %32 = arith.cmpi slt, %25, %c0_i32_10 : i32
    %33 = vector.broadcast %32 : i1 to vector<1x256xi1>
    %34 = vector.broadcast %33 : vector<1x256xi1> to vector<1x256xi1>
    %35 = arith.xori %31, %34 : vector<1x256xi1>
    %36 = arith.andi %35, %29 : vector<1x256xi1>
    %37 = vector.broadcast %25 : i32 to vector<1x256xi32>
    %38 = arith.addi %27, %37 : vector<1x256xi32>
    %39 = arith.select %36, %38, %27 : vector<1x256xi1>, vector<1x256xi32>
    %c-16_i32 = arith.constant -16 : i32
    %40 = vector.broadcast %c-16_i32 : i32 to vector<1x256xi32>
    %41 = arith.addi %23, %40 : vector<1x256xi32>
    %c0_i32_11 = arith.constant 0 : i32
    %42 = vector.broadcast %c0_i32_11 : i32 to vector<1x256xi32>
    %43 = arith.cmpi sge, %41, %42 : vector<1x256xi32>
    %c256_i32 = arith.constant 256 : i32
    %44 = vector.broadcast %c256_i32 : i32 to vector<1x256xi32>
    %45 = arith.cmpi slt, %41, %44 : vector<1x256xi32>
    %46 = arith.andi %43, %45 : vector<1x256xi1>
    %c-1_i32 = arith.constant -1 : i32
    %47 = vector.broadcast %c-1_i32 : i32 to vector<1x256xi32>
    %48 = arith.addi %39, %47 : vector<1x256xi32>
    %c0_i32_12 = arith.constant 0 : i32
    %49 = vector.broadcast %c0_i32_12 : i32 to vector<1x256xi32>
    %50 = arith.cmpi sge, %48, %49 : vector<1x256xi32>
    %c-1_i32_13 = arith.constant -1 : i32
    %51 = vector.broadcast %c-1_i32_13 : i32 to vector<1x256xi32>
    %52 = arith.addi %39, %51 : vector<1x256xi32>
    %c16_i32_14 = arith.constant 16 : i32
    %53 = vector.broadcast %c16_i32_14 : i32 to vector<1x256xi32>
    %54 = arith.cmpi slt, %52, %53 : vector<1x256xi32>
    %55 = arith.andi %50, %54 : vector<1x256xi1>
    %56 = arith.andi %46, %55 : vector<1x256xi1>
    %c0_i32_15 = arith.constant 0 : i32
    %57 = vector.broadcast %c0_i32_15 : i32 to vector<1x256xi32>
    %58 = arith.addi %39, %57 : vector<1x256xi32>
    %c0_i32_16 = arith.constant 0 : i32
    %59 = vector.broadcast %c0_i32_16 : i32 to vector<1x256xi32>
    %60 = arith.cmpi sge, %58, %59 : vector<1x256xi32>
    %c0_i32_17 = arith.constant 0 : i32
    %61 = vector.broadcast %c0_i32_17 : i32 to vector<1x256xi32>
    %62 = arith.addi %39, %61 : vector<1x256xi32>
    %c16_i32_18 = arith.constant 16 : i32
    %63 = vector.broadcast %c16_i32_18 : i32 to vector<1x256xi32>
    %64 = arith.cmpi slt, %62, %63 : vector<1x256xi32>
    %65 = arith.andi %60, %64 : vector<1x256xi1>
    %66 = arith.andi %46, %65 : vector<1x256xi1>
    %c1_i32_19 = arith.constant 1 : i32
    %67 = vector.broadcast %c1_i32_19 : i32 to vector<1x256xi32>
    %68 = arith.addi %39, %67 : vector<1x256xi32>
    %c0_i32_20 = arith.constant 0 : i32
    %69 = vector.broadcast %c0_i32_20 : i32 to vector<1x256xi32>
    %70 = arith.cmpi sge, %68, %69 : vector<1x256xi32>
    %c1_i32_21 = arith.constant 1 : i32
    %71 = vector.broadcast %c1_i32_21 : i32 to vector<1x256xi32>
    %72 = arith.addi %39, %71 : vector<1x256xi32>
    %c16_i32_22 = arith.constant 16 : i32
    %73 = vector.broadcast %c16_i32_22 : i32 to vector<1x256xi32>
    %74 = arith.cmpi slt, %72, %73 : vector<1x256xi32>
    %75 = arith.andi %70, %74 : vector<1x256xi1>
    %76 = arith.andi %46, %75 : vector<1x256xi1>
    %c0_i32_23 = arith.constant 0 : i32
    %77 = vector.broadcast %c0_i32_23 : i32 to vector<1x256xi32>
    %78 = arith.addi %23, %77 : vector<1x256xi32>
    %c0_i32_24 = arith.constant 0 : i32
    %79 = vector.broadcast %c0_i32_24 : i32 to vector<1x256xi32>
    %80 = arith.cmpi sge, %78, %79 : vector<1x256xi32>
    %c256_i32_25 = arith.constant 256 : i32
    %81 = vector.broadcast %c256_i32_25 : i32 to vector<1x256xi32>
    %82 = arith.cmpi slt, %78, %81 : vector<1x256xi32>
    %83 = arith.andi %80, %82 : vector<1x256xi1>
    %c-1_i32_26 = arith.constant -1 : i32
    %84 = vector.broadcast %c-1_i32_26 : i32 to vector<1x256xi32>
    %85 = arith.addi %39, %84 : vector<1x256xi32>
    %c0_i32_27 = arith.constant 0 : i32
    %86 = vector.broadcast %c0_i32_27 : i32 to vector<1x256xi32>
    %87 = arith.cmpi sge, %85, %86 : vector<1x256xi32>
    %c-1_i32_28 = arith.constant -1 : i32
    %88 = vector.broadcast %c-1_i32_28 : i32 to vector<1x256xi32>
    %89 = arith.addi %39, %88 : vector<1x256xi32>
    %c16_i32_29 = arith.constant 16 : i32
    %90 = vector.broadcast %c16_i32_29 : i32 to vector<1x256xi32>
    %91 = arith.cmpi slt, %89, %90 : vector<1x256xi32>
    %92 = arith.andi %87, %91 : vector<1x256xi1>
    %93 = arith.andi %83, %92 : vector<1x256xi1>
    %c1_i32_30 = arith.constant 1 : i32
    %94 = vector.broadcast %c1_i32_30 : i32 to vector<1x256xi32>
    %95 = arith.addi %39, %94 : vector<1x256xi32>
    %c0_i32_31 = arith.constant 0 : i32
    %96 = vector.broadcast %c0_i32_31 : i32 to vector<1x256xi32>
    %97 = arith.cmpi sge, %95, %96 : vector<1x256xi32>
    %c1_i32_32 = arith.constant 1 : i32
    %98 = vector.broadcast %c1_i32_32 : i32 to vector<1x256xi32>
    %99 = arith.addi %39, %98 : vector<1x256xi32>
    %c16_i32_33 = arith.constant 16 : i32
    %100 = vector.broadcast %c16_i32_33 : i32 to vector<1x256xi32>
    %101 = arith.cmpi slt, %99, %100 : vector<1x256xi32>
    %102 = arith.andi %97, %101 : vector<1x256xi1>
    %103 = arith.andi %83, %102 : vector<1x256xi1>
    %c16_i32_34 = arith.constant 16 : i32
    %104 = vector.broadcast %c16_i32_34 : i32 to vector<1x256xi32>
    %105 = arith.addi %23, %104 : vector<1x256xi32>
    %c0_i32_35 = arith.constant 0 : i32
    %106 = vector.broadcast %c0_i32_35 : i32 to vector<1x256xi32>
    %107 = arith.cmpi sge, %105, %106 : vector<1x256xi32>
    %c256_i32_36 = arith.constant 256 : i32
    %108 = vector.broadcast %c256_i32_36 : i32 to vector<1x256xi32>
    %109 = arith.cmpi slt, %105, %108 : vector<1x256xi32>
    %110 = arith.andi %107, %109 : vector<1x256xi1>
    %c-1_i32_37 = arith.constant -1 : i32
    %111 = vector.broadcast %c-1_i32_37 : i32 to vector<1x256xi32>
    %112 = arith.addi %39, %111 : vector<1x256xi32>
    %c0_i32_38 = arith.constant 0 : i32
    %113 = vector.broadcast %c0_i32_38 : i32 to vector<1x256xi32>
    %114 = arith.cmpi sge, %112, %113 : vector<1x256xi32>
    %c-1_i32_39 = arith.constant -1 : i32
    %115 = vector.broadcast %c-1_i32_39 : i32 to vector<1x256xi32>
    %116 = arith.addi %39, %115 : vector<1x256xi32>
    %c16_i32_40 = arith.constant 16 : i32
    %117 = vector.broadcast %c16_i32_40 : i32 to vector<1x256xi32>
    %118 = arith.cmpi slt, %116, %117 : vector<1x256xi32>
    %119 = arith.andi %114, %118 : vector<1x256xi1>
    %120 = arith.andi %110, %119 : vector<1x256xi1>
    %c0_i32_41 = arith.constant 0 : i32
    %121 = vector.broadcast %c0_i32_41 : i32 to vector<1x256xi32>
    %122 = arith.addi %39, %121 : vector<1x256xi32>
    %c0_i32_42 = arith.constant 0 : i32
    %123 = vector.broadcast %c0_i32_42 : i32 to vector<1x256xi32>
    %124 = arith.cmpi sge, %122, %123 : vector<1x256xi32>
    %c0_i32_43 = arith.constant 0 : i32
    %125 = vector.broadcast %c0_i32_43 : i32 to vector<1x256xi32>
    %126 = arith.addi %39, %125 : vector<1x256xi32>
    %c16_i32_44 = arith.constant 16 : i32
    %127 = vector.broadcast %c16_i32_44 : i32 to vector<1x256xi32>
    %128 = arith.cmpi slt, %126, %127 : vector<1x256xi32>
    %129 = arith.andi %124, %128 : vector<1x256xi1>
    %130 = arith.andi %110, %129 : vector<1x256xi1>
    %c1_i32_45 = arith.constant 1 : i32
    %131 = vector.broadcast %c1_i32_45 : i32 to vector<1x256xi32>
    %132 = arith.addi %39, %131 : vector<1x256xi32>
    %c0_i32_46 = arith.constant 0 : i32
    %133 = vector.broadcast %c0_i32_46 : i32 to vector<1x256xi32>
    %134 = arith.cmpi sge, %132, %133 : vector<1x256xi32>
    %c1_i32_47 = arith.constant 1 : i32
    %135 = vector.broadcast %c1_i32_47 : i32 to vector<1x256xi32>
    %136 = arith.addi %39, %135 : vector<1x256xi32>
    %c16_i32_48 = arith.constant 16 : i32
    %137 = vector.broadcast %c16_i32_48 : i32 to vector<1x256xi32>
    %138 = arith.cmpi slt, %136, %137 : vector<1x256xi32>
    %139 = arith.andi %134, %138 : vector<1x256xi1>
    %140 = arith.andi %110, %139 : vector<1x256xi1>
    %141 = tpu.iota {dimensions = array<i32: 0>} : vector<2x1xi32>
    %c1_i32_49 = arith.constant 1 : i32
    %142 = vector.broadcast %c1_i32_49 : i32 to vector<2x1xi32>
    %143 = arith.cmpi slt, %141, %142 : vector<2x1xi32>
    %c0_50 = arith.constant 0 : index
    %c0_51 = arith.constant 0 : index
    %c0_52 = arith.constant 0 : index
    %144 = vector.load %arg1[%c0_50, %c0_51, %c0_52] : memref<1x32x256xf32, #tpu.memory_space<vmem>>, vector<1x32x256xf32>
    %145 = vector.shape_cast %144 : vector<1x32x256xf32> to vector<32x256xf32>
    %cst = arith.constant dense<0.000000e+00> : vector<32xf32>
    %146 = vector.multi_reduction <add>, %145, %cst [1] : vector<32x256xf32> to vector<32xf32>
    %147 = vector.shape_cast %146 : vector<32xf32> to vector<32x1xf32>
    %cst_53 = arith.constant 3.906250e-03 : f32
    %148 = vector.broadcast %cst_53 : f32 to vector<32x1xf32>
    %149 = arith.mulf %147, %148 : vector<32x1xf32>
    %c0_54 = arith.constant 0 : index
    %c0_55 = arith.constant 0 : index
    %c0_56 = arith.constant 0 : index
    %150 = vector.load %arg1[%c0_54, %c0_55, %c0_56] : memref<1x32x256xf32, #tpu.memory_space<vmem>>, vector<1x32x256xf32>
    %151 = vector.shape_cast %150 : vector<1x32x256xf32> to vector<32x256xf32>
    %cst_57 = arith.constant dense<0xFF800000> : vector<32xf32>
    %152 = vector.multi_reduction <maximumf>, %151, %cst_57 [1] : vector<32x256xf32> to vector<32xf32>
    %153 = vector.shape_cast %152 : vector<32xf32> to vector<32x1xf32>
    %154 = tpu.concatenate %149, %153 in 1 : vector<32x1xf32>, vector<32x1xf32> -> vector<32x2xf32>
    %cst_58 = arith.constant dense<0.000000e+00> : vector<2x2xf32>
    %155 = tpu.matmul %0, %154, %cst_58 {dimension_numbers = #tpu.dot_dimension_numbers<[1], [0], [0], [1], [0, 0, 1, 1], [], []>} : vector<2x32xf32>, vector<32x2xf32>, vector<2x2xf32> -> vector<2x2xf32>
    %156 = vector.broadcast %1 : vector<2x1xf32> to vector<2x2xf32>
    %157 = arith.addf %155, %156 : vector<2x2xf32>
    %cst_59 = arith.constant 0.000000e+00 : f32
    %158 = vector.broadcast %cst_59 : f32 to vector<2x2xf32>
    %159 = arith.maximumf %157, %158 : vector<2x2xf32>
    %cst_60 = arith.constant dense<0.000000e+00> : vector<32x2xf32>
    %160 = tpu.matmul %2, %159, %cst_60 {dimension_numbers = #tpu.dot_dimension_numbers<[1], [0], [0], [1], [0, 0, 1, 1], [], []>} : vector<32x2xf32>, vector<2x2xf32>, vector<32x2xf32> -> vector<32x2xf32>
    %161 = vector.broadcast %3 : vector<32x1xf32> to vector<32x2xf32>
    %162 = arith.addf %160, %161 : vector<32x2xf32>
    %163 = vector.extract_strided_slice %162 {offsets = [0, 0], sizes = [32, 1], strides = [1, 1]} : vector<32x2xf32> to vector<32x1xf32>
    %164 = vector.extract_strided_slice %162 {offsets = [0, 1], sizes = [32, 1], strides = [1, 1]} : vector<32x2xf32> to vector<32x1xf32>
    %165 = arith.addf %163, %164 : vector<32x1xf32>
    %166 = arith.negf %165 : vector<32x1xf32>
    %167 = math.exp %166 : vector<32x1xf32>
    %cst_61 = arith.constant 1.000000e+00 : f32
    %168 = vector.broadcast %cst_61 : f32 to vector<32x1xf32>
    %169 = arith.addf %168, %167 : vector<32x1xf32>
    %170 = arith.divf %168, %169 : vector<32x1xf32>
    %c0_62 = arith.constant 0 : index
    %c0_63 = arith.constant 0 : index
    %c0_64 = arith.constant 0 : index
    %171 = vector.load %arg1[%c0_62, %c0_63, %c0_64] : memref<1x32x256xf32, #tpu.memory_space<vmem>>, vector<1x32x256xf32>
    %172 = vector.shape_cast %171 : vector<1x32x256xf32> to vector<32x256xf32>
    %173 = vector.broadcast %170 : vector<32x1xf32> to vector<32x256xf32>
    %174 = arith.mulf %172, %173 : vector<32x256xf32>
    %cst_65 = arith.constant dense<0xFF800000> : vector<256xf32>
    %175 = vector.multi_reduction <maximumf>, %174, %cst_65 [0] : vector<32x256xf32> to vector<256xf32>
    %176 = vector.shape_cast %175 : vector<256xf32> to vector<1x256xf32>
    %cst_66 = arith.constant dense<0.000000e+00> : vector<256xf32>
    %177 = vector.multi_reduction <add>, %174, %cst_66 [0] : vector<32x256xf32> to vector<256xf32>
    %178 = vector.shape_cast %177 : vector<256xf32> to vector<1x256xf32>
    %cst_67 = arith.constant 3.125000e-02 : f32
    %179 = vector.broadcast %cst_67 : f32 to vector<1x256xf32>
    %180 = arith.mulf %178, %179 : vector<1x256xf32>
    %181 = tpu.concatenate %176, %180 in 0 : vector<1x256xf32>, vector<1x256xf32> -> vector<2x256xf32>
    %182 = vector.broadcast %4 : f32 to vector<2x1xf32>
    %183 = vector.broadcast %13 : f32 to vector<2x1xf32>
    %184 = arith.select %143, %182, %183 : vector<2x1xi1>, vector<2x1xf32>
    %c17_i32 = arith.constant 17 : i32
    %185 = tpu.dynamic_rotate %181 by %c17_i32 dim 1 : vector<2x256xf32>, i32 -> vector<2x256xf32>
    %cst_68 = arith.constant 0.000000e+00 : f32
    %186 = vector.shape_cast %56 : vector<1x256xi1> to vector<1x256xi1>
    %187 = vector.broadcast %186 : vector<1x256xi1> to vector<2x256xi1>
    %188 = vector.broadcast %cst_68 : f32 to vector<2x256xf32>
    %189 = arith.select %187, %185, %188 : vector<2x256xi1>, vector<2x256xf32>
    %190 = vector.broadcast %184 : vector<2x1xf32> to vector<2x256xf32>
    %191 = arith.mulf %189, %190 : vector<2x256xf32>
    %192 = vector.broadcast %5 : f32 to vector<2x1xf32>
    %193 = vector.broadcast %14 : f32 to vector<2x1xf32>
    %194 = arith.select %143, %192, %193 : vector<2x1xi1>, vector<2x1xf32>
    %c16_i32_69 = arith.constant 16 : i32
    %195 = tpu.dynamic_rotate %181 by %c16_i32_69 dim 1 : vector<2x256xf32>, i32 -> vector<2x256xf32>
    %cst_70 = arith.constant 0.000000e+00 : f32
    %196 = vector.shape_cast %66 : vector<1x256xi1> to vector<1x256xi1>
    %197 = vector.broadcast %196 : vector<1x256xi1> to vector<2x256xi1>
    %198 = vector.broadcast %cst_70 : f32 to vector<2x256xf32>
    %199 = arith.select %197, %195, %198 : vector<2x256xi1>, vector<2x256xf32>
    %200 = vector.broadcast %194 : vector<2x1xf32> to vector<2x256xf32>
    %201 = arith.mulf %199, %200 : vector<2x256xf32>
    %202 = vector.broadcast %6 : f32 to vector<2x1xf32>
    %203 = vector.broadcast %15 : f32 to vector<2x1xf32>
    %204 = arith.select %143, %202, %203 : vector<2x1xi1>, vector<2x1xf32>
    %c15_i32 = arith.constant 15 : i32
    %205 = tpu.dynamic_rotate %181 by %c15_i32 dim 1 : vector<2x256xf32>, i32 -> vector<2x256xf32>
    %cst_71 = arith.constant 0.000000e+00 : f32
    %206 = vector.shape_cast %76 : vector<1x256xi1> to vector<1x256xi1>
    %207 = vector.broadcast %206 : vector<1x256xi1> to vector<2x256xi1>
    %208 = vector.broadcast %cst_71 : f32 to vector<2x256xf32>
    %209 = arith.select %207, %205, %208 : vector<2x256xi1>, vector<2x256xf32>
    %210 = vector.broadcast %204 : vector<2x1xf32> to vector<2x256xf32>
    %211 = arith.mulf %209, %210 : vector<2x256xf32>
    %212 = vector.broadcast %7 : f32 to vector<2x1xf32>
    %213 = vector.broadcast %16 : f32 to vector<2x1xf32>
    %214 = arith.select %143, %212, %213 : vector<2x1xi1>, vector<2x1xf32>
    %c1_i32_72 = arith.constant 1 : i32
    %215 = tpu.dynamic_rotate %181 by %c1_i32_72 dim 1 : vector<2x256xf32>, i32 -> vector<2x256xf32>
    %cst_73 = arith.constant 0.000000e+00 : f32
    %216 = vector.shape_cast %93 : vector<1x256xi1> to vector<1x256xi1>
    %217 = vector.broadcast %216 : vector<1x256xi1> to vector<2x256xi1>
    %218 = vector.broadcast %cst_73 : f32 to vector<2x256xf32>
    %219 = arith.select %217, %215, %218 : vector<2x256xi1>, vector<2x256xf32>
    %220 = vector.broadcast %214 : vector<2x1xf32> to vector<2x256xf32>
    %221 = arith.mulf %219, %220 : vector<2x256xf32>
    %222 = vector.broadcast %8 : f32 to vector<2x1xf32>
    %223 = vector.broadcast %17 : f32 to vector<2x1xf32>
    %224 = arith.select %143, %222, %223 : vector<2x1xi1>, vector<2x1xf32>
    %225 = vector.broadcast %224 : vector<2x1xf32> to vector<2x256xf32>
    %226 = arith.mulf %181, %225 : vector<2x256xf32>
    %227 = vector.broadcast %9 : f32 to vector<2x1xf32>
    %228 = vector.broadcast %18 : f32 to vector<2x1xf32>
    %229 = arith.select %143, %227, %228 : vector<2x1xi1>, vector<2x1xf32>
    %c255_i32 = arith.constant 255 : i32
    %230 = tpu.dynamic_rotate %181 by %c255_i32 dim 1 : vector<2x256xf32>, i32 -> vector<2x256xf32>
    %cst_74 = arith.constant 0.000000e+00 : f32
    %231 = vector.shape_cast %103 : vector<1x256xi1> to vector<1x256xi1>
    %232 = vector.broadcast %231 : vector<1x256xi1> to vector<2x256xi1>
    %233 = vector.broadcast %cst_74 : f32 to vector<2x256xf32>
    %234 = arith.select %232, %230, %233 : vector<2x256xi1>, vector<2x256xf32>
    %235 = vector.broadcast %229 : vector<2x1xf32> to vector<2x256xf32>
    %236 = arith.mulf %234, %235 : vector<2x256xf32>
    %237 = vector.broadcast %10 : f32 to vector<2x1xf32>
    %238 = vector.broadcast %19 : f32 to vector<2x1xf32>
    %239 = arith.select %143, %237, %238 : vector<2x1xi1>, vector<2x1xf32>
    %c241_i32 = arith.constant 241 : i32
    %240 = tpu.dynamic_rotate %181 by %c241_i32 dim 1 : vector<2x256xf32>, i32 -> vector<2x256xf32>
    %cst_75 = arith.constant 0.000000e+00 : f32
    %241 = vector.shape_cast %120 : vector<1x256xi1> to vector<1x256xi1>
    %242 = vector.broadcast %241 : vector<1x256xi1> to vector<2x256xi1>
    %243 = vector.broadcast %cst_75 : f32 to vector<2x256xf32>
    %244 = arith.select %242, %240, %243 : vector<2x256xi1>, vector<2x256xf32>
    %245 = vector.broadcast %239 : vector<2x1xf32> to vector<2x256xf32>
    %246 = arith.mulf %244, %245 : vector<2x256xf32>
    %247 = vector.broadcast %11 : f32 to vector<2x1xf32>
    %248 = vector.broadcast %20 : f32 to vector<2x1xf32>
    %249 = arith.select %143, %247, %248 : vector<2x1xi1>, vector<2x1xf32>
    %c240_i32 = arith.constant 240 : i32
    %250 = tpu.dynamic_rotate %181 by %c240_i32 dim 1 : vector<2x256xf32>, i32 -> vector<2x256xf32>
    %cst_76 = arith.constant 0.000000e+00 : f32
    %251 = vector.shape_cast %130 : vector<1x256xi1> to vector<1x256xi1>
    %252 = vector.broadcast %251 : vector<1x256xi1> to vector<2x256xi1>
    %253 = vector.broadcast %cst_76 : f32 to vector<2x256xf32>
    %254 = arith.select %252, %250, %253 : vector<2x256xi1>, vector<2x256xf32>
    %255 = vector.broadcast %249 : vector<2x1xf32> to vector<2x256xf32>
    %256 = arith.mulf %254, %255 : vector<2x256xf32>
    %257 = vector.broadcast %12 : f32 to vector<2x1xf32>
    %258 = vector.broadcast %21 : f32 to vector<2x1xf32>
    %259 = arith.select %143, %257, %258 : vector<2x1xi1>, vector<2x1xf32>
    %c239_i32 = arith.constant 239 : i32
    %260 = tpu.dynamic_rotate %181 by %c239_i32 dim 1 : vector<2x256xf32>, i32 -> vector<2x256xf32>
    %cst_77 = arith.constant 0.000000e+00 : f32
    %261 = vector.shape_cast %140 : vector<1x256xi1> to vector<1x256xi1>
    %262 = vector.broadcast %261 : vector<1x256xi1> to vector<2x256xi1>
    %263 = vector.broadcast %cst_77 : f32 to vector<2x256xf32>
    %264 = arith.select %262, %260, %263 : vector<2x256xi1>, vector<2x256xf32>
    %265 = vector.broadcast %259 : vector<2x1xf32> to vector<2x256xf32>
    %266 = arith.mulf %264, %265 : vector<2x256xf32>
    %267 = arith.addf %191, %201 : vector<2x256xf32>
    %268 = arith.addf %211, %221 : vector<2x256xf32>
    %269 = arith.addf %226, %236 : vector<2x256xf32>
    %270 = arith.addf %246, %256 : vector<2x256xf32>
    %271 = arith.addf %267, %268 : vector<2x256xf32>
    %272 = arith.addf %269, %270 : vector<2x256xf32>
    %273 = arith.addf %271, %272 : vector<2x256xf32>
    %274 = arith.addf %273, %266 : vector<2x256xf32>
    %275 = vector.extract_strided_slice %274 {offsets = [0, 0], sizes = [1, 256], strides = [1, 1]} : vector<2x256xf32> to vector<1x256xf32>
    %276 = vector.extract_strided_slice %274 {offsets = [1, 0], sizes = [1, 256], strides = [1, 1]} : vector<2x256xf32> to vector<1x256xf32>
    %277 = arith.addf %275, %276 : vector<1x256xf32>
    %278 = vector.broadcast %22 : f32 to vector<1x256xf32>
    %279 = arith.addf %277, %278 : vector<1x256xf32>
    %280 = arith.negf %279 : vector<1x256xf32>
    %281 = math.exp %280 : vector<1x256xf32>
    %cst_78 = arith.constant 1.000000e+00 : f32
    %282 = vector.broadcast %cst_78 : f32 to vector<1x256xf32>
    %283 = arith.addf %282, %281 : vector<1x256xf32>
    %284 = arith.divf %282, %283 : vector<1x256xf32>
    %285 = vector.broadcast %284 : vector<1x256xf32> to vector<32x256xf32>
    %286 = arith.mulf %174, %285 : vector<32x256xf32>
    %c0_79 = arith.constant 0 : index
    %c0_80 = arith.constant 0 : index
    %c0_81 = arith.constant 0 : index
    %287 = vector.load %arg7[%c0_79, %c0_80, %c0_81] : memref<1x32x256xf32, #tpu.memory_space<vmem>>, vector<1x32x256xf32>
    %288 = vector.shape_cast %287 : vector<1x32x256xf32> to vector<32x256xf32>
    %289 = vector.shape_cast %286 : vector<32x256xf32> to vector<1x32x256xf32>
    tpu.vector_store %arg7[%c0_79, %c0_80, %c0_81], %289 {strides = array<i32>} : memref<1x32x256xf32, #tpu.memory_space<vmem>>, vector<1x32x256xf32>,
    return
  }
  func.func @transform_0(%arg0: i32) -> (i32, i32, i32) {
    %c0_i32 = arith.constant 0 : i32
    %c0_i32_0 = arith.constant 0 : i32
    %c0_i32_1 = arith.constant 0 : i32
    return %arg0, %c0_i32, %c0_i32_0 : i32, i32, i32
  }
  func.func @transform_1(%arg0: i32) -> (i32, i32) {
    %c0_i32 = arith.constant 0 : i32
    %c0_i32_0 = arith.constant 0 : i32
    %c0_i32_1 = arith.constant 0 : i32
    return %c0_i32, %c0_i32_0 : i32, i32
  }
  func.func @transform_2(%arg0: i32) -> (i32, i32) {
    %c0_i32 = arith.constant 0 : i32
    %c0_i32_0 = arith.constant 0 : i32
    %c0_i32_1 = arith.constant 0 : i32
    return %c0_i32, %c0_i32_0 : i32, i32
  }
  func.func @transform_3(%arg0: i32) -> (i32, i32) {
    %c0_i32 = arith.constant 0 : i32
    %c0_i32_0 = arith.constant 0 : i32
    %c0_i32_1 = arith.constant 0 : i32
    return %c0_i32, %c0_i32_0 : i32, i32
  }
  func.func @transform_4(%arg0: i32) -> (i32, i32) {
    %c0_i32 = arith.constant 0 : i32
    %c0_i32_0 = arith.constant 0 : i32
    %c0_i32_1 = arith.constant 0 : i32
    return %c0_i32, %c0_i32_0 : i32, i32
  }
  func.func @transform_5(%arg0: i32) -> i32 {
    %c0_i32 = arith.constant 0 : i32
    %c0_i32_0 = arith.constant 0 : i32
    return %c0_i32 : i32
  }
  func.func @transform_6(%arg0: i32) -> (i32, i32, i32) {
    %c0_i32 = arith.constant 0 : i32
    %c0_i32_0 = arith.constant 0 : i32
    %c0_i32_1 = arith.constant 0 : i32
    return %arg0, %c0_i32, %c0_i32_0 : i32, i32, i32
  }
}

</mosaic_0001>

<bundles_post_ra>
// kernel: tpu_custom_call.1
= control target key start
LH: loop header
LB: loop body
LE: loop exit
PB: predicated region body
PF: predicated region fallthrough
CT: control target
= control target key end

     0   :  { %11 = vsyncpa [#allocation3], 0  ;;  %s1982_s0 = inlined_call_operand.hbm [shape: f32[2,32,256], index: 0, kind: input, shape index: {}]   ;;  %s1983_s1 = inlined_call_operand.vmem [shape: f32[2,32], index: 1, kind: input, shape index: {}]   ;;  %s1984_s2 = inlined_call_operand.vmem [shape: f32[2,1], index: 2, kind: input, shape index: {}]   ;;  %s1985_s3 = inlined_call_operand.vmem [shape: f32[32,2], index: 3, kind: input, shape index: {}]   ;;  %s1986_s4 = inlined_call_operand.vmem [shape: f32[32,1], index: 4, kind: input, shape index: {}]   ;;  %s1987_s5 = inlined_call_operand.vmem [shape: f32[19], index: 5, kind: input, shape index: {}]   ;;  %s1988_s6 = inlined_call_operand.hbm [shape: f32[2,32,256], index: 6, kind: output, shape index: {}]  }
   0x1   :  { %13 = vsyncpa [#allocation3 + $0x1], 0 }
   0x2   :  { %14 = vsyncpa [#allocation5], 0 }
   0x3   :  { %15 = vsyncpa [#allocation4], 0 }
   0x4   :  { %17 = vsyncpa [#allocation4 + $0x1], 0  ;;  %s1421_s21 = smov 0   ;;  %s1423_s22 = smov 0  }
   0x5   :  { %s1425_s23 = smov 0   ;;  %s1427_s24 = smov 0  }
   0x6 LB: > { %s1442_s25 = sadd.s32 4294967295, %s1366_s24   ;;  %s1070_s26 = sadd.s32 4294967294, %s1366_s24   ;;  %s1366_s24 = sphi %s1427_s24, %s2020_s24   ;;  %s1362_s23 = sphi %s1425_s23, %s2019_s23   ;;  %s1358_s22 = sphi %s1423_s22, %s2018_s22   ;;  %s1354_s21 = sphi %s1421_s21, %s2017_s21  }
   0x7   : > { %s1446_s27 = sadd.s32 1, %s1366_s24   ;;  %s30_s28 = sadd.s32 1, %s1362_s23 }
   0x8   : > { %s27_s29 = ssub.s32 %s1366_s24, %s1446_s27  ;;  %p37_p0 = scmp.ne.s32.totalorder %s1362_s23, %s1358_s22 }
   0x9   : > { %p28_p1 = scmp.eq.s32.totalorder %s27_s29, 0  ;;  %p38_p2 = scmp.eq.s32.totalorder %s1366_s24, 0 }
   0xa   : > { %p43_p3 = scmp.ne.s32.totalorder %s1358_s22, %s1354_s21  ;;  %p1990_p4 = scmp.eq.s32.totalorder %s1442_s25, 0 }
   0xb   : > { %s1458_s30 = scalar_select %p28_p1, %s1362_s23, %s30_s28  }
   0xc   : > { %p1460_p5 = por %p38_p2, %p37_p0  ;;  %p1466_p6 = por %p1990_p4, %p43_p3 }
   0xd   : > { %p172_p7 = scmp.eq.s32.totalorder %s1442_s25, 1  ;;  %p178_p8 = scmp.eq.s32.totalorder %s1070_s26, 1 }
   0xe   : > { %s1995_s8 = scalar_select %p1466_p6, 1, 0 }
   0xf   : > { %p1071_p9 = scmp.ge.s32.totalorder %s1366_s24, 1  ;;  %p185_p10 = scmp.lt.s32.totalorder %s1366_s24, 3 }
  0x10   : > { %p1473_p11 = por %p172_p7, %p37_p0  ;;  %p1477_p12 = por %p178_p8, %p43_p3 }
  0x11   : > { %p1481_p13 = pnand %p1071_p9, %p185_p10  ;;  %s210_s14 = sshll.u32 %s1987_s5, 4  ;;  %s211_s14 = int_to_ptr.vmem [resolvable:$true] %s210_s14 }
  0x12   : > { %s1996_s9 = scalar_select %p1473_p11, 1, 0 }
  0x13   : > { %s1997_s10 = scalar_select %p1477_p12, 1, 0 }
  0x14   : > { %p1161_p1 = pneg %p1481_p13  ;;  %p1174_p2 = scmp.lt.s32.totalorder %s1366_s24, 2 }
  0x15   : > { %s221_s16 = sand.u32 1, %s1362_s23   ;;  %s1251_s19 = scalar_lea.vmem %s211_s14, 16 }
  0x16   : > { %p1494_p7 = pnand %p1161_p1, %p1990_p4  ;;  %p1501_p3 = pnand %p1174_p2, %p1460_p5 }
  0x17   : > { %s1074_s18 = sshll.u32 %s221_s16, 6  ;;  %p1252_p8 = scmp.ne.s32.totalorder %s211_s14, %s1251_s19 }
  0x18   : > { %p1253_p9 = pneg %p1494_p7  ;;  %p1259_p12 = scmp.lt.s32.totalorder %s211_s14, %s211_s14 }
  0x19   : > { %p1260_p11 = scmp.lt.s32.totalorder %s1251_s19, %s1251_s19 }
  0x1a   : > { %p1254_p10 = pnand %p1253_p9, %p1252_p8 }
  0x1b   : > { %p1261_p1 = por %p1260_p11, %p1259_p12 }
  0x1c   : > { %p1255_p0 = pneg %p1254_p10 }
  0x1e   : > { %p1262_p4 = pnand %p1261_p1, %p1255_p0 }
  0x20   : > { %1265 = shalt.err (!%p1262_p4)
}
  0x21   : > { %s1368_s20 = smov [#allocation6]   ;;  %s1116_s26 = sshll.u32 %s1366_s24, 10 }
  0x22   : > { %1164 = dma.vmem_to_smem (!%p1494_p7), %s211_s14, 16, %s1368_s20, [#allocation5]  }
  0x23   : > { %s225_s28 = scalar_lea.vmem [#allocation2], %s1074_s18  ;;  %s1513_s13 = scalar_lea.hbm %s1982_s0, %s1116_s26 }
  0x24   : > { %s232_s29 = sshll.u32 %s225_s28, 4  ;;  %s1517_s19 = scalar_lea.sflag [#allocation3], %s221_s16  ;;  %s1515_s29 = int_to_ptr.vmem [resolvable:$true] %s232_s29 }
  0x25   : > { %s1266_s15 = scalar_lea.hbm %s1513_s13, 1024  ;;  %p1268_p5 = pneg %p1501_p3 }
  0x26   : > { %p1267_p4 = scmp.ne.s32.totalorder %s1513_s13, %s1266_s15  ;;  %s1271_s20 = scalar_lea.hbm %s1982_s0, 2048 }
  0x27   : > { %p1272_p0 = scmp.lt.u32.totalorder %s1513_s13, %s1982_s0  ;;  %p1273_p2 = scmp.lt.u32.totalorder %s1271_s20, %s1266_s15 }
  0x28   : > { %p1269_p11 = pnand %p1268_p5, %p1267_p4  ;;  %p1275_p8 = scmp.lt.u32.totalorder %s1266_s15, %s1513_s13 }
  0x29   : > { %p1274_p7 = por %p1273_p2, %p1272_p0 }
  0x2a   : > { %p1270_p12 = pneg %p1269_p11 }
  0x2b   : > { %p1276_p9 = por %p1275_p8, %p1274_p7 }
  0x2d   : > { %p1277_p10 = pnand %p1276_p9, %p1270_p12 }
  0x2f   : > { %1280 = shalt.err (!%p1277_p10)
}
  0x30   : > { %s1281_s16 = scalar_lea.vmem %s1515_s29, 1024  ;;  %s1369_s7 = smov [#allocation2]  }
  0x31   : > { %p1282_p1 = scmp.ne.s32.totalorder %s1515_s29, %s1281_s16  ;;  %s1286_s12 = sshll.u32 %s1369_s7, 4  ;;  %s1287_s12 = int_to_ptr.vmem [resolvable:$false] %s1286_s12 }
  0x32   : > { %s1288_s14 = scalar_lea.vmem %s1287_s12, 2048  ;;  %p1289_p6 = scmp.lt.s32.totalorder %s1515_s29, %s1287_s12 }
  0x33   : > { %p1284_p4 = pnand %p1282_p1, %p1268_p5  ;;  %p1290_p0 = scmp.lt.s32.totalorder %s1288_s14, %s1281_s16 }
  0x35   : > { %p1285_p11 = pneg %p1284_p4  ;;  %p1291_p2 = por %p1290_p0, %p1289_p6 }
  0x37   : > { %p1292_p7 = pnand %p1291_p2, %p1285_p11 }
  0x39   : > { %1295 = shalt.err (!%p1292_p7)
}
  0x3a   : > { %s1370_s15 = smov 256   ;;  %s1371_s18 = smov 16  }
  0x3b   : > { %1168 = dma.hbm_to_vmem [thread:$0]  (!%p1501_p3), %s1513_s13, 1024, %s1515_s29, %s1517_s19, %s1370_s15, %s1370_s15, %s1371_s18  }
  0x3c   : > { %244 = sbr.rel (%p1481_p13) target bundleno = 1175 (0x497), region = 44  ;;  %s1548_s20 = sand.u32 (!%p1481_p13), 1, %s1358_s22  }
  0x3d   : > { %s1993_s26 = sshll.u32 (!%p1481_p13), %s1548_s20, 6  ;;  %s247_s28 = scalar_lea.sflag (!%p1481_p13), [#allocation3], %s1548_s20 }
  0x3e   : > { %s250_s16 = scalar_lea.vmem (!%p1481_p13), [#allocation2], %s1993_s26  ;;  %p2001_p6 = scmp.ne.s32.totalorder (!%p1481_p13), %s1995_s8, 0 }
  0x43   : > { %1341 = dma.done.wait (%p2001_p6), %s247_s28, 1024  }
  0x44   : > { %1343 = vsyncadd (%p2001_p6), %s247_s28, 4294966272  ;;  %p2002_p3 = scmp.eq.s32.totalorder %s1442_s25, 0 }
  0x46   : > { %1345 = dma.done.wait (%p2002_p3), [#allocation5], 16   ;;  %p2003_p13 = pmov %p2002_p3 }
  0x48   : > { %1347 = vsyncadd (%p2003_p13), [#allocation5], 4294967280 }
  0x49   : > { %259 = sfence }
  0x4a   : > { %v1562_v0 = vld [vmem:[%s250_s16] sm:$0xff]  ;;  %v1564_v1 = vld [vmem:[%s250_s16 + $0x8] sm:$0xff]  ;;  %v1566_v2 = vld [vmem:[%s250_s16 + $0x10] sm:$0xff]  ;;  %v1372_v16 = vmov 0.0|0.0   ;;  %vm1373_vm0 = vmmov 0   ;;  %v1374_v17 = vmov 0.0  }
  0x4b   : > { %v427_v3 = vmax.f32 %v1562_v0, %v1564_v1  ;;  %v411_v4 = vadd.f32 %v1564_v1, %v1562_v0  ;;  %v1572_v5 = vld [vmem:[%s250_s16 + $0x18] sm:$0xff]  ;;  %v1578_v8 = vld [vmem:[%s250_s16 + $0x30] sm:$0xff]  ;;  %v1582_v10 = vld [vmem:[%s250_s16 + $0x20] sm:$0xff]  ;;  %1147 = vmatprep.subr.bf16.mxu0 %v1372_v16  ;;  %1136 = vmatprep.mubr.msk.f32.mxu0 %vm1373_vm0, %v1374_v17  ;;  %v1375_v19 = vmov 0   ;;  %vm439_vm1 = vcmask 7168   ;;  %s1376_s12 = smov 127  }
  0x4c   : > { %v430_v6 = vmax.f32 %v1566_v2, %v1572_v5  ;;  %v414_v7 = vadd.f32 %v1572_v5, %v1566_v2  ;;  %v1580_v9 = vld [vmem:[%s250_s16 + $0x38] sm:$0xff]  ;;  %v1584_v11 = vld [vmem:[%s250_s16 + $0x28] sm:$0xff]  ;;  %v285_v18 = vld [vmem:[%s1984_s2] sm:$0x3]  ;;  %1225 = vset.pattern.permute.xlu0 %v1375_v19  ;;  %1226 = vset.pattern.permute.xlu1 %v1375_v19  ;;  %vm449_vm2 = vcmask 261120   ;;  %vm544_vm3 = vcmask 15360  }
  0x4d   : > { %428 = vmax.xlane.f32.xlu1 %v427_v3  ;;  %412 = vadd.xlane.f32.xlu0 %v411_v4  ;;  %v420_v12 = vadd.f32 %v1580_v9, %v1578_v8  ;;  %v417_v13 = vadd.f32 %v1584_v11, %v1582_v10  ;;  %v436_v14 = vmax.f32 %v1578_v8, %v1580_v9  ;;  %v284_v38 = vld [vmem:[%s1983_s1] sm:$0x3]  ;;  %v291_v41 = vld [vmem:[%s1986_s4 + $0x8] sm:$0xff]  ;;  %v292_v42 = vld [vmem:[%s1986_s4 + $0x10] sm:$0xff]  ;;  %vm557_vm4 = vcmask 1041408   ;;  %s1377_s14 = smov 17  }
  0x4e   : > { %v433_v15 = vmax.f32 %v1582_v10, %v1584_v11  ;;  %v286_v39 = vld [vmem:[%s1985_s3] sm:$0xff]  ;;  %v293_v43 = vld [vmem:[%s1986_s4 + $0x18] sm:$0xff]  ;;  %v287_v49 = vld [vmem:[%s1985_s3 + $0x8] sm:$0xff]  ;;  %vm756_vm5 = vcmask 1040384   ;;  %s1992_s15 = smov 16   ;;  %s1379_s18 = smov 15  }
  0x4f   : > { %1141 = vmatprep.mubr.msk.f32.mxu1 %vm544_vm3, %v286_v39  ;;  %v290_v40 = vld [vmem:[%s1986_s4] sm:$0xff]  ;;  %v288_v50 = vld [vmem:[%s1985_s3 + $0x10] sm:$0xff]  ;;  %v289_v51 = vld [vmem:[%s1985_s3 + $0x18] sm:$0xff]  ;;  %s1380_s28 = smov 1   ;;  %s1381_s16 = smov 113  }
  0x50   : > { %s1382_s8 = smov 112   ;;  %s1383_s11 = smov 111  }
  0x51   : > { %431 = vmax.xlane.f32.xlu1 %v430_v6  ;;  %415 = vadd.xlane.f32.xlu0 %v414_v7  ;;  %s1084_s17 = sld [smem:[#allocation6 + $0x4]]  ;;  %s1093_s29 = sld [smem:[#allocation6 + $0xd]] }
  0x52   : > { %s1699_s13 = sld [smem:[#allocation6]]  ;;  %s1701_s19 = sld [smem:[#allocation6 + $0x9]] }
  0x53   : > { %s1710_s7 = sld [smem:[#allocation6 + $0x1]]  ;;  %s1740_s26 = sld [smem:[#allocation6 + $0xf]] }
  0x54   : > { %p2013_p12 = scmp.ne.s32.totalorder %s1996_s9, 0 }
  0x55   : > { %421 = vadd.xlane.f32.xlu1 %v420_v12  ;;  %418 = vadd.xlane.f32.xlu0 %v417_v13 }
  0x59   : > { %437 = vmax.xlane.f32.xlu1 %v436_v14  ;;  %434 = vmax.xlane.f32.xlu0 %v433_v15 }
  0x6a   : > { %526 = vperm.xlu1 %1226, %v290_v40  }
  0x6e   : > { %531 = vperm.xlu1 %1226, %v291_v41  }
  0x6f   : > { %446 = vperm.xlu0 %1225, %v285_v18  }
  0x72   : > { %536 = vperm.xlu1 %1226, %v292_v42  }
  0x76   : > { %541 = vperm.xlu1 %1226, %v293_v43  }
  0xda   : > { %v429_v20 = vpop.xlane.xlu1 %428  ;;  %v413_v21 = vpop.xlane.xlu0 %412 }
  0xdb   : > { %v423_v22 = vmul.f32 0.00390625, %v413_v21 }
  0xdd   : > { %v440_v26 = vsel %vm439_vm1, %v423_v22, %v429_v20 }
  0xde   : > { %v432_v23 = vpop.xlane.xlu1 %431  ;;  %v416_v24 = vpop.xlane.xlu0 %415 }
  0xdf   : > { %v424_v25 = vmul.f32 0.00390625, %v416_v24 }
  0xe1   : > { %v441_v27 = vsel %vm439_vm1, %v424_v25, %v432_v23 }
  0xe2   : > { %v422_v28 = vpop.xlane.xlu1 %421  ;;  %v419_v29 = vpop.xlane.xlu0 %418  ;;  %v1148_v30 = vpack.c.bf16 %v441_v27, %v440_v26 }
  0xe3   : > { %v426_v31 = vmul.f32 0.00390625, %v422_v28  ;;  %v425_v32 = vmul.f32 0.00390625, %v419_v29 }
  0xe4   : > { %1149 = vmatpush3.bf16.msra.mxu0 %v1148_v30 }
  0xe5   : > { %1150 = vmatprep.subr.bf16.mxu0 %v1372_v16 }
  0xe6   : > { %v438_v33 = vpop.xlane.xlu1 %437  ;;  %v435_v34 = vpop.xlane.xlu0 %434 }
  0xe7   : > { %v443_v35 = vsel %vm439_vm1, %v426_v31, %v438_v33  ;;  %v442_v36 = vsel %vm439_vm1, %v425_v32, %v435_v34 }
  0xe8   : > { %v1151_v37 = vpack.c.bf16 %v443_v35, %v442_v36 }
  0xea   : > { %1152 = vmatpush3.bf16.msra.mxu0 %v1151_v37  ;;  %v527_v52 = vpop.permute.xlu1 %526 }
  0xed   : > { %1137 = vmatmul.mubr.msk.f32.vlgmr.msra.gmra.mrb[0].mxu0 %vm449_vm2, %v284_v38 }
  0xee   : > { %v447_v44 = vpop.permute.xlu0 %446  ;;  %v532_v53 = vpop.permute.xlu1 %531 }
  0xf2   : > { %v537_v60 = vpop.permute.xlu1 %536 }
  0xf6   : > { %v542_v62 = vpop.permute.xlu1 %541 }
 0x1c0   : > { %v519_v45 = vpop.f32.mrb[0].mxu0 }
 0x1c1   : > { %v520_v46 = vadd.f32 %v519_v45, %v447_v44  ;;  %v1138_v47 = vpop.f32.mrb[1].mxu0 }
 0x1c3   : > { %v523_v48 = vmax.f32 %v520_v46, 0.0 }
 0x1c5   : > { %1139 = vmatprep.subr.msk.mxu1 %vm557_vm4, %v523_v48 }
 0x1c6   : > { %1140 = vmatpush3.msk.msra.mxu1 %vm557_vm4, %v523_v48 }
 0x1c7   : > { %1142 = vmatmul.mubr.msk.f32.vlgmr.msra.gmra.mrb[0].mxu1 %vm544_vm3, %v287_v49 }
 0x1c8   : > { %1144 = vmatprep.mubr.msk.f32.mxu1 %vm544_vm3, %v288_v50 }
 0x1cb   : > { %1145 = vmatmul.mubr.msk.f32.gmra.mrb[2].mxu1 %vm544_vm3, %v289_v51 }
 0x29a   : > { %v1143_v54 = vpop.f32.mrb[0].mxu1 }
 0x29b   : > { %v633_v55 = vadd.f32 %v1143_v54, %v532_v53  ;;  %v627_v56 = vpop.f32.mrb[1].mxu1 }
 0x29c   : > { %v628_v58 = vadd.f32 %v627_v56, %v527_v52 }
 0x29d   : > { %652 = vrot.lane.b32.xlu1 %v633_v55, %s1376_s12 }
 0x29e   : > { %v1146_v57 = vpop.f32.mrb[2].mxu1 }
 0x29f   : > { %v637_v59 = vpop.f32.mrb[3].mxu1  ;;  %v643_v63 = vadd.f32 %v1146_v57, %v542_v62 }
 0x2a0   : > { %v638_v61 = vadd.f32 %v637_v59, %v537_v60 }
 0x2a1   : > { %650 = vrot.lane.b32.xlu1 %v628_v58, %s1376_s12 }
 0x2a5   : > { %654 = vrot.lane.b32.xlu1 %v638_v61, %s1376_s12 }
 0x2a9   : > { %656 = vrot.lane.b32.xlu1 %v643_v63, %s1376_s12 }
 0x30f   : > { %v653_v3 = vpop.permute.xlu1 %652 }
 0x310   : > { %v663_v4 = vadd.f32 %v653_v3, %v633_v55 }
 0x312   : > { %v1106_v6 = vmul.f32 -1.442695, %v663_v4 }
 0x313   : > { %v651_v7 = vpop.permute.xlu1 %650 }
 0x314   : > { %1227 = vpow2.f32 %v1106_v6  ;;  %v662_v12 = vadd.f32 %v651_v7, %v628_v58 }
 0x316   : > { %v1105_v13 = vmul.f32 -1.442695, %v662_v12 }
 0x317   : > { %v655_v14 = vpop.permute.xlu1 %654 }
 0x318   : > { %1229 = vpow2.f32 %v1105_v13  ;;  %v664_v15 = vadd.f32 %v655_v14, %v638_v61 }
 0x31a   : > { %v1107_v16 = vmul.f32 -1.442695, %v664_v15 }
 0x31b   : > { %v657_v17 = vpop.permute.xlu1 %656 }
 0x31c   : > { %1231 = vpow2.f32 %v1107_v16  ;;  %v665_v18 = vadd.f32 %v657_v17, %v643_v63 }
 0x31e   : > { %v1228_v19 = vpop.eup %1227  ;;  %v1108_v20 = vmul.f32 -1.442695, %v665_v18 }
 0x31f   : > { %v679_v21 = vadd.f32 1.0, %v1228_v19 }
 0x320   : > { %1233 = vpow2.f32 %v1108_v20  ;;  %v313_v20 = vlaneseq }
 0x321   : > { %1235 = vrcp.f32 %v679_v21 }
 0x322   : > { %v1230_v22 = vpop.eup %1229  ;;  %v1696_v21 = vand.u32 127, %v313_v20 }
 0x323   : > { %v678_v23 = vadd.f32 1.0, %v1230_v22 }
 0x324   : > { %v315_v22 = vadd.s32 128, %v1696_v21  ;;  %vm766_vm10 = vcmp.lt.s32.totalorder %v1696_v21, 17  ;;  %vm784_vm11 = vcmp.lt.s32.totalorder %v1696_v21, 16  ;;  %vm802_vm13 = vcmp.lt.s32.totalorder %v1696_v21, 15 }
 0x325   : > { %1237 = vrcp.f32 %v678_v23  ;;  %v1703_v23 = vshrl.u32 %v313_v20, 7  ;;  %vm820_vm15 = vcmp.lt.s32.totalorder %v1696_v21, 1  ;;  %vm843_vm0 = vcmp.lt.s32.totalorder %v1696_v21, 127 }
 0x326   : > { %v1232_v24 = vpop.eup %1231  ;;  %vm861_vm2 = vcmp.lt.s32.totalorder %v1696_v21, 113  ;;  %vm879_vm4 = vcmp.lt.s32.totalorder %v1696_v21, 112 }
 0x327   : > { %v680_v25 = vadd.f32 1.0, %v1232_v24  ;;  %vm402_vm6 = vcmp.lt.s32.totalorder %v1703_v23, 1 }
 0x329   : > { %1239 = vrcp.f32 %v680_v25  ;;  %v320_v25 = vand.u32 15, %v1696_v21 }
 0x32a   : > { %v1234_v26 = vpop.eup %1233 }
 0x32b   : > { %v1236_v27 = vpop.eup %1235  ;;  %v681_v28 = vadd.f32 1.0, %v1234_v26 }
 0x32c   : > { %697 = vperm.xlu1 %1226, %v1236_v27   ;;  %v327_v27 = vand.u32 15, %v315_v22 }
 0x32d   : > { %1241 = vrcp.f32 %v681_v28  ;;  %v1723_v28 = vadd.s32 4294967280, %v1696_v21 }
 0x32f   : > { %v1238_v29 = vpop.eup %1237  ;;  %vm342_vm7 = vcmp.ge.s32.totalorder %v1723_v28, 0 }
 0x330   : > { %692 = vperm.xlu0 %1225, %v1238_v29   ;;  %v831_v29 = vstv %s1084_s17  ;;  %s1744_s17 = sld [smem:[#allocation6 + $0x7]] }
 0x333   : > { %v1240_v30 = vpop.eup %1239 }
 0x334   : > { %702 = vperm.xlu0 %1225, %v1240_v30   ;;  %v832_v30 = vstv %s1093_s29  ;;  %s1746_s29 = sld [smem:[#allocation6 + $0x10]] }
 0x337   : > { %v1242_v31 = vpop.eup %1241 }
 0x338   : > { %707 = vperm.xlu1 %1226, %v1242_v31   ;;  %v1726_v31 = vadd.s32 4294967295, %v320_v25 }
 0x33a   : > { %vm350_vm8 = vcmp.ge.s32.totalorder %v1726_v31, 0 }
 0x33b   : > { %vm1808_vm3 = vmand %vm342_vm7, %vm350_vm8 }
 0x3ab   : > { %v698_v33 = vpop.permute.xlu1 %697 }
 0x3ac   : > { %v1639_v37 = vmul.f32 %v698_v33, %v1566_v2  ;;  %v1642_v38 = vmul.f32 %v698_v33, %v1572_v5 }
 0x3af   : > { %v693_v32 = vpop.permute.xlu0 %692 }
 0x3b0   : > { %v1633_v34 = vmul.f32 %v693_v32, %v1562_v0  ;;  %v1636_v35 = vmul.f32 %v693_v32, %v1564_v1 }
 0x3b2   : > { %v736_v0 = vadd.f32 %v1639_v37, %v1633_v34  ;;  %v745_v1 = vadd.f32 %v1642_v38, %v1636_v35 }
 0x3b3   : > { %v703_v36 = vpop.permute.xlu0 %702 }
 0x3b4   : > { %v1645_v39 = vmul.f32 %v703_v36, %v1582_v10  ;;  %v1648_v40 = vmul.f32 %v703_v36, %v1584_v11  ;;  %v1736_v36 = vadd.s32 4294967295, %v327_v27 }
 0x3b6   : > { %v737_v42 = vadd.f32 %v736_v0, %v1645_v39  ;;  %v746_v2 = vadd.f32 %v745_v1, %v1648_v40  ;;  %v718_v11 = vmax.f32 %v1633_v34, %v1645_v39  ;;  %v727_v43 = vmax.f32 %v1636_v35, %v1648_v40 }
 0x3b7   : > { %v708_v41 = vpop.permute.xlu1 %707  ;;  %v833_v0 = vsel %vm402_vm6, %v831_v29, %v832_v30  ;;  %v759_v1 = vstv %s1699_s13  ;;  %vm351_vm9 = vcmp.ge.s32.totalorder %v1736_v36, 0  ;;  %s1769_s13 = sld [smem:[#allocation6 + $0x8]] }
 0x3b8   : > { %v1657_v5 = vmul.f32 %v708_v41, %v1578_v8  ;;  %v1660_v10 = vmul.f32 %v708_v41, %v1580_v9  ;;  %v760_v41 = vstv %s1701_s19  ;;  %s1771_s19 = sld [smem:[#allocation6 + $0x11]] }
 0x3ba   : > { %v719_v44 = vmax.f32 %v1639_v37, %v1657_v5  ;;  %v728_v45 = vmax.f32 %v1642_v38, %v1660_v10  ;;  %v738_v46 = vadd.f32 %v737_v42, %v1657_v5  ;;  %v747_v8 = vadd.f32 %v746_v2, %v1660_v10 }
 0x3bb   : > { %v1751_v42 = vadd.s32 1, %v320_v25  ;;  %v777_v2 = vstv %s1710_s7  ;;  %s2012_s7 = sshll.u32 %s1548_s20, 6 }
 0x3bc   : > { %v720_v47 = vmax.f32 %v718_v11, %v719_v44  ;;  %v729_v48 = vmax.f32 %v727_v43, %v728_v45  ;;  %v739_v9 = vrot.slane %v738_v46, 4  ;;  %v748_v49 = vrot.slane %v747_v8, 4 }
 0x3bd   : > { %v1756_v44 = vadd.s32 1, %v327_v27  ;;  %vm370_vm12 = vcmp.lt.s32.totalorder %v1751_v42, 16 }
 0x3be   : > { %v721_v50 = vrot.slane %v720_v47, 4  ;;  %v730_v51 = vrot.slane %v729_v48, 4  ;;  %v740_v52 = vadd.f32 %v739_v9, %v738_v46  ;;  %v749_v53 = vadd.f32 %v748_v49, %v747_v8 }
 0x3bf   : > { %vm371_vm14 = vcmp.lt.s32.totalorder %v1756_v44, 16 }
 0x3c0   : > { %v722_v54 = vmax.f32 %v720_v47, %v721_v50  ;;  %v731_v55 = vmax.f32 %v729_v48, %v730_v51  ;;  %v741_v56 = vrot.slane %v740_v52, 2  ;;  %v750_v57 = vrot.slane %v749_v53, 2 }
 0x3c1   : > { %v1764_v47 = vsel %vm402_vm6, %v759_v1, %v760_v41  ;;  %v1777_v50 = vadd.s32 16, %v315_v22  ;;  %v890_v22 = vstv %s1769_s13 }
 0x3c2   : > { %v723_v58 = vrot.slane %v722_v54, 2  ;;  %v732_v59 = vrot.slane %v731_v55, 2  ;;  %v742_v60 = vadd.f32 %v741_v56, %v740_v52  ;;  %v751_v61 = vadd.f32 %v750_v57, %v749_v53 }
 0x3c3   : > { %vm391_vm1 = vcmp.lt.s32.totalorder %v1777_v50, 256 }
 0x3c4   : > { %v724_v62 = vmax.f32 %v722_v54, %v723_v58  ;;  %v733_v63 = vmax.f32 %v731_v55, %v732_v59  ;;  %v743_v3 = vrot.slane %v742_v60, 1  ;;  %v752_v4 = vrot.slane %v751_v61, 1 }
 0x3c5   : > { %v855_v58 = vstv %s1740_s26  ;;  %s1098_s26 = sld [smem:[#allocation6 + $0x12]] }
 0x3c6   : > { %v725_v6 = vrot.slane %v724_v62, 1  ;;  %v734_v7 = vrot.slane %v733_v63, 1  ;;  %v744_v12 = vadd.f32 %v743_v3, %v742_v60  ;;  %v753_v13 = vadd.f32 %v752_v4, %v751_v61 }
 0x3c7   : > { %v872_v61 = vstv %s1744_s17 }
 0x3c8   : > { %v726_v14 = vmax.f32 %v724_v62, %v725_v6  ;;  %v735_v15 = vmax.f32 %v733_v63, %v734_v7  ;;  %v754_v16 = vmul.f32 0.03125, %v744_v12  ;;  %v755_v17 = vmul.f32 0.03125, %v753_v13 }
 0x3c9   : > { %v873_v62 = vstv %s1746_s29 }
 0x3ca   : > { %v1672_v18 = vsel %vm756_vm5, %v726_v14, %v754_v16  ;;  %v1674_v19 = vsel %vm756_vm5, %v735_v15, %v755_v17  ;;  %v874_v17 = vsel %vm402_vm6, %v872_v61, %v873_v62  ;;  %vm1837_vm5 = vmand %vm342_vm7, %vm370_vm12 }
 0x3cb   : > { %764 = vrot.lane.b32.xlu1 %v1674_v19, %s1377_s14  ;;  %762 = vrot.lane.b32.xlu0 %v1672_v18, %s1377_s14  ;;  %s1714_s14 = sld [smem:[#allocation6 + $0x2]]  ;;  %v1792_v59 = vmul.f32 %v833_v0, %v1674_v19  ;;  %v1795_v60 = vmul.f32 %v833_v0, %v1672_v18 }
 0x3cf   : > { %782 = vrot.lane.b32.xlu1 %v1674_v19, %s1992_s15  ;;  %780 = vrot.lane.b32.xlu0 %v1672_v18, %s1992_s15  ;;  %s1738_s15 = sld [smem:[#allocation6 + $0x6]] }
 0x3d1   : > { %v795_v46 = vstv %s1714_s14 }
 0x3d3   : > { %800 = vrot.lane.b32.xlu1 %v1674_v19, %s1379_s18  ;;  %798 = vrot.lane.b32.xlu0 %v1672_v18, %s1379_s18  ;;  %s1716_s18 = sld [smem:[#allocation6 + $0xb]] }
 0x3d5   : > { %v854_v57 = vstv %s1738_s15  ;;  %s1117_s15 = sshll.u32 %s1442_s25, 10  ;;  %s972_s25 = scalar_lea.sflag [#allocation4], %s1548_s20 }
 0x3d6   : > { %v856_v13 = vsel %vm402_vm6, %v854_v57, %v855_v58 }
 0x3d7   : > { %818 = vrot.lane.b32.xlu1 %v1674_v19, %s1380_s28  ;;  %816 = vrot.lane.b32.xlu0 %v1672_v18, %s1380_s28  ;;  %s1718_s28 = sld [smem:[#allocation6 + $0x3]] }
 0x3d9   : > { %v796_v8 = vstv %s1716_s18 }
 0x3da   : > { %v1782_v51 = vsel %vm402_vm6, %v795_v46, %v796_v8 }
 0x3db   : > { %841 = vrot.lane.b32.xlu1 %v1674_v19, %s1376_s12  ;;  %839 = vrot.lane.b32.xlu0 %v1672_v18, %s1376_s12  ;;  %s1712_s12 = sld [smem:[#allocation6 + $0xa]] }
 0x3dd   : > { %v813_v48 = vstv %s1718_s28 }
 0x3df   : > { %859 = vrot.lane.b32.xlu1 %v1674_v19, %s1381_s16  ;;  %857 = vrot.lane.b32.xlu0 %v1672_v18, %s1381_s16  ;;  %s1720_s16 = sld [smem:[#allocation6 + $0xc]] }
 0x3e1   : > { %v778_v11 = vstv %s1712_s12  ;;  %s283_s12 = scalar_lea.vmem [#allocation7], %s2012_s7 }
 0x3e2   : > { %v779_v49 = vsel %vm402_vm6, %v777_v2, %v778_v11  ;;  %s985_s14 = sshll.u32 %s283_s12, 4  ;;  %s1937_s14 = int_to_ptr.vmem [resolvable:$true] %s985_s14 }
 0x3e3   : > { %877 = vrot.lane.b32.xlu1 %v1674_v19, %s1382_s8  ;;  %875 = vrot.lane.b32.xlu0 %v1672_v18, %s1382_s8  ;;  %s1732_s8 = sld [smem:[#allocation6 + $0x5]] }
 0x3e5   : > { %v814_v9 = vstv %s1720_s16  ;;  %s1931_s16 = scalar_lea.hbm %s1988_s6, %s1117_s15 }
 0x3e6   : > { %v815_v56 = vsel %vm402_vm6, %v813_v48, %v814_v9 }
 0x3e7   : > { %895 = vrot.lane.b32.xlu1 %v1674_v19, %s1383_s11  ;;  %893 = vrot.lane.b32.xlu0 %v1672_v18, %s1383_s11  ;;  %s1734_s11 = sld [smem:[#allocation6 + $0xe]] }
 0x3e9   : > { %v836_v54 = vstv %s1732_s8  ;;  %s1296_s8 = scalar_lea.vmem %s1937_s14, 1024 }
 0x3ea   : > { %p1297_p5 = scmp.ne.s32.totalorder %s1937_s14, %s1296_s8 }
 0x3ec   : > { %p1298_p8 = pnand %p1297_p5, %p2013_p12 }
 0x3ed   : > { %v837_v55 = vstv %s1734_s11  ;;  %s1384_s11 = smov [#allocation7]  }
 0x3ee   : > { %v838_v63 = vsel %vm402_vm6, %v836_v54, %v837_v55  ;;  %p1299_p9 = pneg %p1298_p8  ;;  %s1300_s17 = sshll.u32 %s1384_s11, 4  ;;  %s1301_s17 = int_to_ptr.vmem [resolvable:$false] %s1300_s17 }
 0x3ef   : > { %s1302_s29 = scalar_lea.vmem %s1301_s17, 2048  ;;  %p1303_p10 = scmp.lt.s32.totalorder %s1937_s14, %s1301_s17 }
 0x3f0   : > { %p1304_p1 = scmp.lt.s32.totalorder %s1302_s29, %s1296_s8 }
 0x3f2   : > { %p1305_p4 = por %p1304_p1, %p1303_p10 }
 0x3f4   : > { %p1306_p11 = pnand %p1305_p4, %p1299_p9 }
 0x43d   : > { %v1705_v24 = vpop.permute.xlu1 %764  ;;  %v1708_v26 = vpop.permute.xlu0 %762 }
 0x43e   : > { %v768_v4 = vsel %vm766_vm10, %v1705_v24, %v1708_v26  ;;  %v767_v14 = vsel %vm766_vm10, %v1708_v26, %v1705_v24  ;;  %v891_v24 = vstv %s1771_s19  ;;  %vm897_vm10 = vcmp.lt.s32.totalorder %v1696_v21, 111 }
 0x43f   : > { %v773_v25 = vsel %vm1808_vm3, %v768_v4, 0.0  ;;  %v774_v30 = vsel %vm351_vm9, %v767_v14, 0.0 }
 0x440   : > { %v775_v46 = vmul.f32 %v773_v25, %v1764_v47  ;;  %v776_v9 = vmul.f32 %v774_v30, %v1764_v47 }
 0x441   : > { %v1728_v32 = vpop.permute.xlu1 %782  ;;  %v1730_v33 = vpop.permute.xlu0 %780 }
 0x442   : > { %v786_v15 = vsel %vm784_vm11, %v1728_v32, %v1730_v33  ;;  %v785_v0 = vsel %vm784_vm11, %v1730_v33, %v1728_v32  ;;  %v932_v32 = vstv %s1098_s26 }
 0x443   : > { %v791_v1 = vsel %vm342_vm7, %v786_v15, 0.0  ;;  %vm1904_vm7 = vmand %vm391_vm1, %vm371_vm14 }
 0x444   : > { %v793_v55 = vmul.f32 %v791_v1, %v779_v49 }
 0x445   : > { %v801_v43 = vpop.permute.xlu1 %800  ;;  %v799_v45 = vpop.permute.xlu0 %798 }
 0x446   : > { %v804_v19 = vsel %vm802_vm13, %v801_v43, %v799_v45  ;;  %v803_v26 = vsel %vm802_vm13, %v799_v45, %v801_v43  ;;  %vm1874_vm13 = vmand %vm391_vm1, %vm351_vm9  ;;  %v908_v18 = vadd.f32 %v793_v55, %v775_v46 }
 0x447   : > { %v809_v43 = vsel %vm1837_vm5, %v804_v19, 0.0  ;;  %v810_v8 = vsel %vm371_vm14, %v803_v26, 0.0 }
 0x448   : > { %v811_v57 = vmul.f32 %v809_v43, %v1782_v51  ;;  %v812_v4 = vmul.f32 %v810_v8, %v1782_v51 }
 0x449   : > { %v819_v52 = vpop.permute.xlu1 %818  ;;  %v817_v53 = vpop.permute.xlu0 %816 }
 0x44a   : > { %v822_v6 = vsel %vm820_vm15, %v819_v52, %v817_v53  ;;  %v821_v16 = vsel %vm820_vm15, %v817_v53, %v819_v52  ;;  %v794_v52 = vmul.f32 %v785_v0, %v779_v49 }
 0x44b   : > { %v827_v27 = vsel %vm350_vm8, %v822_v6, 0.0  ;;  %v828_v41 = vsel %vm351_vm9, %v821_v16, 0.0 }
 0x44c   : > { %v829_v48 = vmul.f32 %v827_v27, %v815_v56  ;;  %v830_v53 = vmul.f32 %v828_v41, %v815_v56  ;;  %v909_v19 = vadd.f32 %v794_v52, %v776_v9 }
 0x44d   : > { %v842_v7 = vpop.permute.xlu1 %841  ;;  %v840_v12 = vpop.permute.xlu0 %839 }
 0x44e   : > { %v844_v20 = vsel %vm843_vm0, %v840_v12, %v842_v7  ;;  %v845_v29 = vsel %vm843_vm0, %v842_v7, %v840_v12  ;;  %v910_v31 = vadd.f32 %v829_v48, %v811_v57  ;;  %v911_v14 = vadd.f32 %v830_v53, %v812_v4 }
 0x44f   : > { %v850_v45 = vsel %vm370_vm12, %v844_v20, 0.0  ;;  %v851_v36 = vsel %vm371_vm14, %v845_v29, 0.0 }
 0x450   : > { %v852_v58 = vmul.f32 %v850_v45, %v838_v63  ;;  %v853_v6 = vmul.f32 %v851_v36, %v838_v63  ;;  %v892_v63 = vsel %vm402_vm6, %v890_v22, %v891_v24  ;;  %v916_v29 = vadd.f32 %v910_v31, %v908_v18 }
 0x451   : > { %v860_v2 = vpop.permute.xlu1 %859  ;;  %v858_v11 = vpop.permute.xlu0 %857  ;;  %v917_v24 = vadd.f32 %v911_v14, %v909_v19 }
 0x452   : > { %v862_v28 = vsel %vm861_vm2, %v858_v11, %v860_v2  ;;  %v863_v33 = vsel %vm861_vm2, %v860_v2, %v858_v11  ;;  %v912_v20 = vadd.f32 %v852_v58, %v1795_v60 }
 0x453   : > { %v868_v54 = vsel %vm350_vm8, %v862_v28, 0.0  ;;  %v869_v61 = vsel %vm1874_vm13, %v863_v33, 0.0 }
 0x454   : > { %v870_v7 = vmul.f32 %v868_v54, %v856_v13  ;;  %v871_v15 = vmul.f32 %v869_v61, %v856_v13  ;;  %v913_v13 = vadd.f32 %v853_v6, %v1792_v59  ;;  %v949_v54 = vsub.s32 0, %v1703_v23 }
 0x455   : > { %v878_v62 = vpop.permute.xlu1 %877  ;;  %v876_v3 = vpop.permute.xlu0 %875 }
 0x456   : > { %v880_v47 = vsel %vm879_vm4, %v876_v3, %v878_v62  ;;  %v881_v56 = vsel %vm879_vm4, %v878_v62, %v876_v3 }
 0x457   : > { %v887_v49 = vsel %vm391_vm1, %v881_v56, 0.0  ;;  %v888_v12 = vmul.f32 %v880_v47, %v874_v17 }
 0x458   : > { %v889_v16 = vmul.f32 %v887_v49, %v874_v17 }
 0x459   : > { %v914_v25 = vadd.f32 %v888_v12, %v870_v7  ;;  %v896_v26 = vpop.permute.xlu1 %895  ;;  %v894_v27 = vpop.permute.xlu0 %893 }
 0x45a   : > { %v915_v17 = vadd.f32 %v889_v16, %v871_v15  ;;  %v898_v44 = vsel %vm897_vm10, %v894_v27, %v896_v26  ;;  %v899_v50 = vsel %vm897_vm10, %v896_v26, %v894_v27 }
 0x45b   : > { %v918_v30 = vadd.f32 %v914_v25, %v912_v20  ;;  %v904_v22 = vsel %vm370_vm12, %v898_v44, 0.0  ;;  %v905_v60 = vsel %vm1904_vm7, %v899_v50, 0.0 }
 0x45c   : > { %v919_v0 = vadd.f32 %v915_v17, %v913_v13  ;;  %v906_v1 = vmul.f32 %v904_v22, %v892_v63  ;;  %v907_v2 = vmul.f32 %v905_v60, %v892_v63 }
 0x45d   : > { %v920_v59 = vadd.f32 %v918_v30, %v916_v29 }
 0x45e   : > { %v921_v41 = vadd.f32 %v919_v0, %v917_v24 }
 0x45f   : > { %v922_v11 = vadd.f32 %v920_v59, %v906_v1 }
 0x460   : > { %v923_v43 = vadd.f32 %v921_v41, %v907_v2 }
 0x461   : > { %v926_v45 = vrot.slane %v922_v11, 1 }
 0x462   : > { %v927_v21 = vrot.slane %v923_v43, 1 }
 0x463   : > { %v930_v28 = vadd.f32 %v926_v45, %v922_v11 }
 0x464   : > { %v931_v33 = vadd.f32 %v927_v21, %v923_v43 }
 0x465   : > { %v933_v46 = vadd.f32 %v932_v32, %v930_v28 }
 0x466   : > { %v934_v42 = vadd.f32 %v932_v32, %v931_v33 }
 0x467   : > { %v1109_v8 = vmul.f32 -1.442695, %v933_v46 }
 0x468   : > { %v1110_v48 = vmul.f32 -1.442695, %v934_v42 }
 0x469   : > { %1243 = vpow2.f32 %v1109_v8 }
 0x46a   : > { %1245 = vpow2.f32 %v1110_v48 }
 0x473   : > { %v1244_v36 = vpop.eup %1243 }
 0x474   : > { %v1246_v9 = vpop.eup %1245  ;;  %v941_v52 = vadd.f32 1.0, %v1244_v36 }
 0x475   : > { %v942_v53 = vadd.f32 1.0, %v1246_v9 }
 0x476   : > { %1247 = vrcp.f32 %v941_v52 }
 0x477   : > { %1249 = vrcp.f32 %v942_v53 }
 0x480   : > { %v1248_v55 = vpop.eup %1247 }
 0x481   : > { %v1250_v57 = vpop.eup %1249  ;;  %v950_v58 = vrot.slane %v1248_v55, %v949_v54 }
 0x482   : > { %v954_v61 = vrot.slane %v1250_v57, %v949_v54 }
 0x483   : > { %v955_v62 = vmul.f32 %v950_v58, %v1633_v34  ;;  %v957_v3 = vmul.f32 %v950_v58, %v1639_v37  ;;  %v959_v4 = vmul.f32 %v950_v58, %v1645_v39  ;;  %v961_v6 = vmul.f32 %v950_v58, %v1657_v5 }
 0x484   : > { %v956_v23 = vmul.f32 %v954_v61, %v1636_v35  ;;  %v958_v47 = vmul.f32 %v954_v61, %v1642_v38  ;;  %v960_v56 = vmul.f32 %v954_v61, %v1648_v40  ;;  %v962_v34 = vmul.f32 %v954_v61, %v1660_v10 }
 0x485   : > { %963 = vst [vmem:[%s283_s12] sm:$0xff] %v955_v62  ;;  %965 = vst [vmem:[%s283_s12 + $0x10] sm:$0xff] %v957_v3 }
 0x486   : > { %967 = vst [vmem:[%s283_s12 + $0x20] sm:$0xff] %v959_v4  ;;  %969 = vst [vmem:[%s283_s12 + $0x30] sm:$0xff] %v961_v6 }
 0x487   : > { %964 = vst [vmem:[%s283_s12 + $0x8] sm:$0xff] %v956_v23  ;;  %966 = vst [vmem:[%s283_s12 + $0x18] sm:$0xff] %v958_v47 }
 0x488   : > { %968 = vst [vmem:[%s283_s12 + $0x28] sm:$0xff] %v960_v56  ;;  %970 = vst [vmem:[%s283_s12 + $0x38] sm:$0xff] %v962_v34 }
 0x489   : > { %1309 = shalt.err (!%p1306_p11)
}
 0x48a   : > { %s1310_s13 = scalar_lea.hbm %s1931_s16, 1024  ;;  %s1314_s15 = scalar_lea.hbm %s1988_s6, 2048 }
 0x48b   : > { %p1311_p0 = scmp.ne.s32.totalorder %s1931_s16, %s1310_s13  ;;  %p1315_p6 = scmp.lt.u32.totalorder %s1931_s16, %s1988_s6 }
 0x48c   : > { %p1316_p3 = scmp.lt.u32.totalorder %s1314_s15, %s1310_s13  ;;  %p1318_p5 = scmp.lt.u32.totalorder %s1310_s13, %s1931_s16 }
 0x48d   : > { %p1312_p2 = pnand %p1311_p0, %p2013_p12 }
 0x48e   : > { %p1317_p13 = por %p1316_p3, %p1315_p6 }
 0x48f   : > { %p1313_p7 = pneg %p1312_p2 }
 0x490   : > { %p1319_p8 = por %p1318_p5, %p1317_p13 }
 0x492   : > { %p1320_p9 = pnand %p1319_p8, %p1313_p7 }
 0x494   : > { %1323 = shalt.err (!%p1320_p9)
}
 0x495   : > { %s1385_s18 = smov 256   ;;  %s2014_s28 = smov 16  }
 0x496   : > { %1159 = dma.vmem_to_hbm [thread:$0]  (%p2013_p12), %s1937_s14, 1024, %s1931_s16, %s972_s25, %s1385_s18, %s1385_s18, %s2014_s28  }
 0x497 PF: > { %s1000_s8 = sand.u32 1, %s1354_s21   ;;  %p2015_p10 = scmp.ne.s32.totalorder %s1997_s10, 0 }
 0x498   : > { %p2016_p1 = scmp.ge.s32.totalorder %s1366_s24, 2  ;;  %s1001_s11 = scalar_lea.sflag [#allocation4], %s1000_s8 }
 0x49a   : > { %p1170_p4 = pnand %p2016_p1, %p2015_p10 }
 0x49c   : > { %1349 = dma.done.wait (!%p1170_p4), %s1001_s11, 1024  }
 0x49d   : > { %1351 = vsyncadd (!%p1170_p4), %s1001_s11, 4294966272  ;;  %p20_p11 = scmp.ge.s32.totalorder %s1446_s27, 4   ;;  %s2017_s21 = smov %s1358_s22 }
 0x49e   : > { %s2018_s22 = smov %s1362_s23  ;;  %s2019_s23 = smov %s1458_s30 }
 0x49f   : > { %s2020_s24 = smov %s1446_s27  ;;  %22 = sbr.rel (!%p20_p11) target bundleno = 6 (0x6), region = 94 }
 0x4a6   :  { %1006 = vsyncpa [#allocation3], 1 }
 0x4a7   :  { %1008 = vsyncpa [#allocation3 + $0x1], 1 }
 0x4a8   :  { %1009 = vsyncpa [#allocation4], 1 }
 0x4a9   :  { %1011 = vsyncpa [#allocation4 + $0x1], 1 }
 0x4aa   :  { %1012 = vsyncpa [#allocation5], 1 }
 0x4ab   :  { %1014 = vsyncpa [#allocation5 + $0x1], 1 }

</bundles_post_ra>
